<compile_context>
chip_gen: v5e
topology: v5e:2x2
jax: 0.10.0
libtpu: 0.0.40
codegen_flags: <defaults>
</compile_context>

<pallas_src>
import jax
import jax.numpy as jnp
from jax.experimental import pallas as pl
from jax.experimental.pallas import tpu as pltpu


def _mlp_kernel(x_ref, w1_ref, b1_ref, w2_ref, b2_ref, o_ref):
    # x_ref : (TB, D)   streamed            w1_ref: (D, H)  VMEM-resident
    # b1_ref: (1, H)    VMEM-resident       w2_ref: (8, H)  row 0 = w2^T, rest 0
    # b2_ref: (1, 1)    scalar in SMEM      o_ref : (1, 1, TB) lane-dense slab
    x = x_ref[...].astype(w1_ref.dtype)      # bf16 MXU operands when requested
    h = jnp.dot(x, w1_ref[...], preferred_element_type=jnp.float32)
    h = jnp.maximum(h + b1_ref[...].astype(jnp.float32), 0.0)      # (TB, H) f32

    # Layer 2 as w2_row @ h^T -> (8, TB): batch rows land on lanes so the store
    # below is a single unmasked, lane-dense slab (no (TB, 1) masked stores).
    # TODO(synk): per perf review, verify via the bundle dump that this
    # transposed-RHS dot does not emit an explicit XLU transpose of h; if it
    # does, switch layer 2 to a VPU multiply + XLU lane reduction.
    y8 = jax.lax.dot_general(
        w2_ref[...], h.astype(w2_ref.dtype),
        dimension_numbers=(((1,), (1,)), ((), ())),
        preferred_element_type=jnp.float32)                        # (8, TB)
    y = y8[0:1, :] + b2_ref[0, 0]                                  # (1, TB)
    o_ref[...] = y.reshape(1, 1, o_ref.shape[-1])


def _round_up(n, m):
    return ((n + m - 1) // m) * m


def neural_net_forward(x, w1, b1, w2, b2, *, block_rows=8192,
                       mxu_dtype=jnp.float32):
    """Pallas forward pass of NeuralNet.

    x: (B, D), w1: (D, H), b1: (1, H), w2: (H, 1), b2: (1, 1).
    Returns (B,) f32 (matches PyTorch's .squeeze(1)).
    `mxu_dtype=jnp.bfloat16` trades exact f32 parity for ~3x faster MXU work
    on v6e/v7x (accumulation stays f32).
    """
    B, D = x.shape
    H = w1.shape[1]
    assert w1.shape == (D, H) and b1.shape == (1, H)
    assert w2.shape == (H, 1) and b2.shape == (1, 1)

    # Pad only to a multiple of 128 (zero-copy when B is already aligned).
    b_pad = _round_up(max(B, 1), 128)
    if b_pad != B:
        x = jnp.pad(x, ((0, b_pad - B), (0, 0)))

    # Batch tile: large (amortizes ~600-cycle per-step overhead), multiple of
    # 128 (lane-dense aligned output), capped at ~ceil(B/2) so B > 128 always
    # yields >= 2 tiles for the two v7x TensorCores.
    tb_cap = _round_up(max((B + 1) // 2, 1), 128)
    tb = max(128, min(_round_up(block_rows, 128), tb_cap))
    num_tiles = pl.cdiv(b_pad, tb)          # boundary block may read OOB rows;
                                            # they are sliced off below.
    # TODO(synk): v7x-only row-packing (x -> (B/8, 8*D) with block-diagonal W1)
    # if bundle dumps show vmatmul cadence as the limiter.

    w1 = w1.astype(mxu_dtype)
    b1 = b1.astype(jnp.float32)
    b2 = b2.astype(jnp.float32)
    # Layer-2 weight as a lane-major row, zero-padded to 8 sublanes so the MXU
    # LHS operand has a native sublane count.
    w2_row = jnp.pad(w2.astype(mxu_dtype).reshape(1, H), ((0, 7), (0, 0)))

    out_elems = num_tiles * tb
    cost = pl.CostEstimate(
        flops=2 * b_pad * D * H            # layer 1 matmul
        + 2 * b_pad * H                    # bias + ReLU
        + 2 * out_elems * 8 * H,           # padded layer-2 dot
        transcendentals=0,
        bytes_accessed=(x.dtype.itemsize * b_pad * D
                        + w1.dtype.itemsize * D * H
                        + 4 * H
                        + w2_row.dtype.itemsize * 8 * H
                        + 4
                        + 4 * out_elems),
    )

    out = pl.pallas_call(
        _mlp_kernel,
        out_shape=jax.ShapeDtypeStruct((num_tiles, 1, tb), jnp.float32),
        grid=(num_tiles,),
        in_specs=[
            pl.BlockSpec((tb, D), lambda i: (i, 0)),            # x: streamed
            pl.BlockSpec((D, H), lambda i: (0, 0)),             # w1: resident
            pl.BlockSpec((1, H), lambda i: (0, 0)),             # b1: resident
            pl.BlockSpec((8, H), lambda i: (0, 0)),             # w2 row: resident
            pl.BlockSpec(memory_space=pltpu.MemorySpace.SMEM),  # b2: scalar
        ],
        out_specs=pl.BlockSpec((1, 1, tb), lambda i: (i, 0, 0)),
        compiler_params=pltpu.CompilerParams(
            dimension_semantics=("parallel",),    # shard tiles across TCs (v7x)
            vmem_limit_bytes=48 * 1024 * 1024,    # big tiles on v5e; <64MiB v7x
        ),
        cost_estimate=cost,
    )(x, w1, b1, w2_row, b2)

    # (num_tiles, 1, TB) -> flat -> drop padded/OOB rows; matches .squeeze(1).
    return out.reshape(out_elems)[:B]


def _reference_forward(x, w1, b1, w2, b2):
    """Plain-JAX (f32) reference for correctness checking."""
    h = jnp.maximum(x @ w1 + b1, 0.0)
    return (h @ w2 + b2)[:, 0]


if __name__ == "__main__":
    # Shapes consistent with the module: batch=8, input_dim=32, hidden=64.
    B, D, H = 8, 32, 64

    key = jax.random.PRNGKey(0)
    kx, kw1, kb1, kw2, kb2, kx2 = jax.random.split(key, 6)

    x = jax.random.normal(kx, (B, D), dtype=jnp.float32)

    # Deterministic parameter init (synthetic, PyTorch-Linear-like uniform).
    bound1 = 1.0 / jnp.sqrt(D)
    w1 = jax.random.uniform(kw1, (D, H), jnp.float32, -bound1, bound1)
    b1 = jax.random.uniform(kb1, (1, H), jnp.float32, -bound1, bound1)
    bound2 = 1.0 / jnp.sqrt(H)
    w2 = jax.random.uniform(kw2, (H, 1), jnp.float32, -bound2, bound2)
    b2 = jax.random.uniform(kb2, (1, 1), jnp.float32, -bound2, bound2)

    # 1) f32 path, single tile: exact parity with the reference.
    y = neural_net_forward(x, w1, b1, w2, b2)
    jax.block_until_ready(y)
    y_ref = _reference_forward(x, w1, b1, w2, b2)
    assert y.shape == (B,)
    assert jnp.allclose(y, y_ref, atol=1e-5, rtol=1e-5)

    # 2) Multi-tile path (grid=3, exact tiles, small 128-padding of x).
    B2 = 300
    x2 = jax.random.normal(kx2, (B2, D), dtype=jnp.float32)
    y2_ref = _reference_forward(x2, w1, b1, w2, b2)
    y2 = neural_net_forward(x2, w1, b1, w2, b2, block_rows=128)
    jax.block_until_ready(y2)
    assert y2.shape == (B2,)
    assert jnp.allclose(y2, y2_ref, atol=1e-5, rtol=1e-5)

    # 3) Default (large) tile on a non-divisible batch: exercises the OOB
    #    boundary block (grid=2, second block reads past the padded array).
    y3 = neural_net_forward(x2, w1, b1, w2, b2)
    jax.block_until_ready(y3)
    assert jnp.allclose(y3, y2_ref, atol=1e-5, rtol=1e-5)

    # 4) Optional bf16-MXU path (looser tolerance; not exact f32 parity).
    y4 = neural_net_forward(x2, w1, b1, w2, b2, mxu_dtype=jnp.bfloat16)
    jax.block_until_ready(y4)
    assert jnp.allclose(y4, y2_ref, atol=5e-2, rtol=5e-2)

    print("KERNEL_OK")
</pallas_src>

<mosaic_0001>
module attributes {stable_mosaic.version = 11 : i64} {
  func.func @_mlp_kernel(%arg0: i32, %arg1: memref<128x32xf32, #tpu.memory_space<vmem>>, %arg2: memref<32x64xf32, #tpu.memory_space<vmem>>, %arg3: memref<1x64xf32, #tpu.memory_space<vmem>>, %arg4: memref<8x64xf32, #tpu.memory_space<vmem>>, %arg5: memref<1x1xf32, #tpu.memory_space<smem>>, %arg6: memref<1x1x128xf32, #tpu.memory_space<vmem>>) attributes {dimension_semantics = [#tpu.dimension_semantics<parallel>], iteration_bounds = array<i64: 1>, scalar_prefetch = 0 : i64, scratch_operands = 0 : i64, tpu.core_type = #tpu.core_type<tc>, window_params = [{transform_indices = @transform_0, window_bounds = array<i64: 128, 32>}, {pipeline_mode = #tpu.pipeline_mode<synchronous>, transform_indices = @transform_1, window_bounds = array<i64: 32, 64>}, {pipeline_mode = #tpu.pipeline_mode<synchronous>, transform_indices = @transform_2, window_bounds = array<i64: 1, 64>}, {pipeline_mode = #tpu.pipeline_mode<synchronous>, transform_indices = @transform_3, window_bounds = array<i64: 8, 64>}, {transform_indices = @transform_4, window_bounds = array<i64: 1, 1>}, {transform_indices = @transform_5, window_bounds = array<i64: 1, 1, 128>}]} {
    %c0 = arith.constant 0 : index
    %c0_0 = arith.constant 0 : index
    %0 = vector.load %arg1[%c0, %c0_0] : memref<128x32xf32, #tpu.memory_space<vmem>>, vector<128x32xf32>
    %c0_1 = arith.constant 0 : index
    %c0_2 = arith.constant 0 : index
    %1 = vector.load %arg2[%c0_1, %c0_2] : memref<32x64xf32, #tpu.memory_space<vmem>>, vector<32x64xf32>
    %cst = arith.constant dense<0.000000e+00> : vector<128x64xf32>
    %2 = tpu.matmul %0, %1, %cst {dimension_numbers = #tpu.dot_dimension_numbers<[1], [0], [0], [1], [0, 0, 1, 1], [], []>} : vector<128x32xf32>, vector<32x64xf32>, vector<128x64xf32> -> vector<128x64xf32>
    %c0_3 = arith.constant 0 : index
    %c0_4 = arith.constant 0 : index
    %3 = vector.load %arg3[%c0_3, %c0_4] : memref<1x64xf32, #tpu.memory_space<vmem>>, vector<1x64xf32>
    %4 = vector.broadcast %3 : vector<1x64xf32> to vector<128x64xf32>
    %5 = arith.addf %2, %4 : vector<128x64xf32>
    %cst_5 = arith.constant 0.000000e+00 : f32
    %6 = vector.broadcast %cst_5 : f32 to vector<128x64xf32>
    %7 = arith.maximumf %5, %6 : vector<128x64xf32>
    %c0_6 = arith.constant 0 : index
    %c0_7 = arith.constant 0 : index
    %8 = vector.load %arg4[%c0_6, %c0_7] : memref<8x64xf32, #tpu.memory_space<vmem>>, vector<8x64xf32>
    %cst_8 = arith.constant dense<0.000000e+00> : vector<8x128xf32>
    %9 = tpu.matmul %8, %7, %cst_8 {dimension_numbers = #tpu.dot_dimension_numbers<[1], [1], [0], [0], [0, 0, 1, 0], [], []>} : vector<8x64xf32>, vector<128x64xf32>, vector<8x128xf32> -> vector<8x128xf32>
    %10 = vector.extract_strided_slice %9 {offsets = [0, 0], sizes = [1, 128], strides = [1, 1]} : vector<8x128xf32> to vector<1x128xf32>
    %c0_9 = arith.constant 0 : index
    %c0_10 = arith.constant 0 : index
    %11 = memref.load %arg5[%c0_9, %c0_10] : memref<1x1xf32, #tpu.memory_space<smem>>
    %12 = vector.broadcast %11 : f32 to vector<1x128xf32>
    %13 = arith.addf %10, %12 : vector<1x128xf32>
    %14 = vector.shape_cast %13 : vector<1x128xf32> to vector<1x1x128xf32>
    %c0_11 = arith.constant 0 : index
    %c0_12 = arith.constant 0 : index
    %c0_13 = arith.constant 0 : index
    %15 = vector.load %arg6[%c0_11, %c0_12, %c0_13] : memref<1x1x128xf32, #tpu.memory_space<vmem>>, vector<1x1x128xf32>
    tpu.vector_store %arg6[%c0_11, %c0_12, %c0_13], %14 {strides = array<i32>} : memref<1x1x128xf32, #tpu.memory_space<vmem>>, vector<1x1x128xf32>,
    return
  }
  func.func @transform_0(%arg0: i32) -> (i32, i32) {
    %c0_i32 = arith.constant 0 : i32
    %c0_i32_0 = arith.constant 0 : i32
    return %arg0, %c0_i32 : i32, i32
  }
  func.func @transform_1(%arg0: i32) -> (i32, i32) {
    %c0_i32 = arith.constant 0 : i32
    %c0_i32_0 = arith.constant 0 : i32
    %c0_i32_1 = arith.constant 0 : i32
    return %c0_i32, %c0_i32_0 : i32, i32
  }
  func.func @transform_2(%arg0: i32) -> (i32, i32) {
    %c0_i32 = arith.constant 0 : i32
    %c0_i32_0 = arith.constant 0 : i32
    %c0_i32_1 = arith.constant 0 : i32
    return %c0_i32, %c0_i32_0 : i32, i32
  }
  func.func @transform_3(%arg0: i32) -> (i32, i32) {
    %c0_i32 = arith.constant 0 : i32
    %c0_i32_0 = arith.constant 0 : i32
    %c0_i32_1 = arith.constant 0 : i32
    return %c0_i32, %c0_i32_0 : i32, i32
  }
  func.func @transform_4(%arg0: i32) -> (i32, i32) {
    %c0_i32 = arith.constant 0 : i32
    %c0_i32_0 = arith.constant 0 : i32
    %c0_i32_1 = arith.constant 0 : i32
    return %c0_i32, %c0_i32_0 : i32, i32
  }
  func.func @transform_5(%arg0: i32) -> (i32, i32, i32) {
    %c0_i32 = arith.constant 0 : i32
    %c0_i32_0 = arith.constant 0 : i32
    %c0_i32_1 = arith.constant 0 : i32
    return %arg0, %c0_i32, %c0_i32_0 : i32, i32, i32
  }
}

</mosaic_0001>

<bundles_post_ra>
// kernel: tpu_custom_call.1
= control target key start
LH: loop header
LB: loop body
LE: loop exit
PB: predicated region body
PF: predicated region fallthrough
CT: control target
= control target key end

     0   :  { %vm46_vm0 = vcmask 261120   ;;  %s474_s0 = inlined_call_operand.vmem [shape: f32[128,32], index: 0, kind: input, shape index: {}]   ;;  %s475_s1 = inlined_call_operand.vmem [shape: f32[32,64], index: 1, kind: input, shape index: {}]   ;;  %s476_s2 = inlined_call_operand.vmem [shape: f32[1,64], index: 2, kind: input, shape index: {}]   ;;  %s477_s3 = inlined_call_operand.vmem [shape: f32[8,64], index: 3, kind: input, shape index: {}]   ;;  %s478_s4 = inlined_call_operand.<no memory space> [shape: f32[1,1], index: 4, kind: input, shape index: {}]   ;;  %s479_s5 = inlined_call_operand.hbm [shape: f32[1,1,128], index: 5, kind: output, shape index: {}]  }
   0x1   :  { %v41_v0 = vld [vmem:[%s475_s1 + $0x18] sm:$0xff]  ;;  %v40_v1 = vld [vmem:[%s475_s1 + $0x10] sm:$0xff]  ;;  %v39_v2 = vld [vmem:[%s475_s1 + $0x8] sm:$0xff] }
   0x2   :  { %302 = vmatpush.msra.mxu2 %v41_v0  ;;  %303 = vmatpush.msra.mxu3 %v41_v0  ;;  %v38_v3 = vld [vmem:[%s475_s1] sm:$0xff]  ;;  %v28_v4 = vld [vmem:[%s474_s0 + $0x30] sm:$0xff] }
   0x3   :  { %107 = vmatpush.msra.mxu0 %v41_v0  ;;  %v34_v5 = vld [vmem:[%s474_s0 + $0x60] sm:$0xff] }
   0x4   :  { %304 = vmatpush.msra.mxu2 %v40_v1  ;;  %305 = vmatpush.msra.mxu3 %v40_v1 }
   0x5   :  { %108 = vmatpush.msra.mxu0 %v40_v1 }
   0x6   :  { %306 = vmatpush.msra.mxu2 %v39_v2  ;;  %307 = vmatpush.msra.mxu3 %v39_v2 }
   0x7   :  { %11 = vsyncpa [#allocation4], 0  ;;  %109 = vmatpush.msra.mxu0 %v39_v2  ;;  %v22_v6 = vld [vmem:[%s474_s0] sm:$0xff]  ;;  %v29_v7 = vld [vmem:[%s474_s0 + $0x38] sm:$0xff]  ;;  %vm177_vm1 = vcmask 523264   ;;  %s338_s10 = smov [#allocation3]  }
   0x8   :  { %308 = vmatpush.msra.mxu2 %v38_v3  ;;  %309 = vmatpush.msra.mxu3 %v38_v3  ;;  %v35_v8 = vld [vmem:[%s474_s0 + $0x68] sm:$0xff]  ;;  %v30_v10 = vld [vmem:[%s474_s0 + $0x40] sm:$0xff]  ;;  %v36_v11 = vld [vmem:[%s474_s0 + $0x70] sm:$0xff]  ;;  %s258_s11 = sshll.u32 %s338_s10, 4  ;;  %s260_s14 = sshll.u32 %s479_s5, 4  ;;  %s259_s11 = int_to_ptr.vmem [resolvable:$true] %s258_s11  ;;  %s261_s14 = int_to_ptr.hbm [resolvable:$true] %s260_s14 }
   0x9   :  { %275 = vmatmul.msk.f32.vlgmr.msra.gmra.mxu2 %vm46_vm0, %v28_v4  ;;  %281 = vmatmul.msk.f32.vlgmr.msra.gmra.mxu3 %vm46_vm0, %v34_v5  ;;  %v23_v9 = vld [vmem:[%s474_s0 + $0x8] sm:$0xff]  ;;  %v24_v12 = vld [vmem:[%s474_s0 + $0x10] sm:$0xff]  ;;  %v37_v14 = vld [vmem:[%s474_s0 + $0x78] sm:$0xff] }
   0xa   :  { %110 = vmatpush.msra.mxu0 %v38_v3  ;;  %v31_v13 = vld [vmem:[%s474_s0 + $0x48] sm:$0xff]  ;;  %v25_v15 = vld [vmem:[%s474_s0 + $0x18] sm:$0xff]  ;;  %v32_v16 = vld [vmem:[%s474_s0 + $0x50] sm:$0xff] }
   0xb   :  { %269 = vmatmul.msk.f32.vlgmr.msra.gmra.mxu0 %vm46_vm0, %v22_v6  ;;  %v26_v17 = vld [vmem:[%s474_s0 + $0x20] sm:$0xff]  ;;  %v33_v18 = vld [vmem:[%s474_s0 + $0x58] sm:$0xff]  ;;  %v27_v19 = vld [vmem:[%s474_s0 + $0x28] sm:$0xff]  ;;  %v250_v6 = vstv %s478_s4 }
   0xc   :  { %v311_v28 = vld [vmem:[%s476_s2] ss:$0 sm:$0xff] }
   0xd   :  { %v176_v5 = vld [vmem:[%s477_s3] sm:$0xff] }
  0x11   :  { %276 = vmatmul.msk.f32.gmra.mxu2 %vm46_vm0, %v29_v7  ;;  %282 = vmatmul.msk.f32.gmra.mxu3 %vm46_vm0, %v35_v8 }
  0x13   :  { %270 = vmatmul.msk.f32.gmra.mxu0 %vm46_vm0, %v23_v9 }
  0x19   :  { %277 = vmatmul.msk.f32.gmra.mxu2 %vm46_vm0, %v30_v10  ;;  %283 = vmatmul.msk.f32.gmra.mxu3 %vm46_vm0, %v36_v11 }
  0x1b   :  { %271 = vmatmul.msk.f32.gmra.mxu0 %vm46_vm0, %v24_v12 }
  0x21   :  { %278 = vmatmul.msk.f32.gmra.mxu2 %vm46_vm0, %v31_v13  ;;  %284 = vmatmul.msk.f32.gmra.mxu3 %vm46_vm0, %v37_v14 }
  0x23   :  { %272 = vmatmul.msk.f32.gmra.mxu0 %vm46_vm0, %v25_v15 }
  0x29   :  { %279 = vmatmul.msk.f32.gmra.mxu2 %vm46_vm0, %v32_v16 }
  0x2b   :  { %273 = vmatmul.msk.f32.gmra.mxu0 %vm46_vm0, %v26_v17 }
  0x31   :  { %280 = vmatmul.msk.f32.gmra.mxu2 %vm46_vm0, %v33_v18 }
  0x33   :  { %274 = vmatmul.msk.f32.gmra.mxu0 %vm46_vm0, %v27_v19 }
  0x88   :  { %v112_v22 = vpop.f32.mrf.mxu0 }
  0x89   :  { %v113_v2 = vadd.f32 %v311_v28, %v112_v22 }
  0x8b   :  { %v160_v4 = vmax.f32 %v113_v2, 0.0 }
  0x8c   :  { %v130_v20 = vpop.f32.mrf.mxu2  ;;  %v148_v21 = vpop.f32.mrf.mxu3 }
  0x8d   :  { %v149_v38 = vadd.f32 %v311_v28, %v148_v21  ;;  %v131_v54 = vadd.f32 %v311_v28, %v130_v20 }
  0x8f   :  { %v172_v41 = vmax.f32 %v149_v38, 0.0  ;;  %v166_v57 = vmax.f32 %v131_v54, 0.0 }
  0x90   :  { %v115_v27 = vpop.f32.mrf.mxu0 }
  0x91   :  { %v116_v0 = vadd.f32 %v311_v28, %v115_v27 }
  0x93   :  { %v161_v3 = vmax.f32 %v116_v0, 0.0 }
  0x94   :  { %v133_v23 = vpop.f32.mrf.mxu2  ;;  %v151_v24 = vpop.f32.mrf.mxu3 }
  0x95   :  { %v152_v35 = vadd.f32 %v311_v28, %v151_v24  ;;  %v134_v51 = vadd.f32 %v311_v28, %v133_v23 }
  0x97   :  { %v173_v39 = vmax.f32 %v152_v35, 0.0  ;;  %v167_v55 = vmax.f32 %v134_v51, 0.0 }
  0x98   :  { %v118_v34 = vpop.f32.mrf.mxu0 }
  0x99   :  { %v119_v62 = vadd.f32 %v311_v28, %v118_v34 }
  0x9b   :  { %v162_v1 = vmax.f32 %v119_v62, 0.0 }
  0x9c   :  { %v136_v25 = vpop.f32.mrf.mxu2  ;;  %v154_v26 = vpop.f32.mrf.mxu3 }
  0x9d   :  { %v155_v32 = vadd.f32 %v311_v28, %v154_v26  ;;  %v137_v49 = vadd.f32 %v311_v28, %v136_v25 }
  0x9f   :  { %v174_v36 = vmax.f32 %v155_v32, 0.0  ;;  %v168_v52 = vmax.f32 %v137_v49, 0.0 }
  0xa0   :  { %v121_v40 = vpop.f32.mrf.mxu0 }
  0xa1   :  { %v122_v60 = vadd.f32 %v311_v28, %v121_v40 }
  0xa3   :  { %v163_v63 = vmax.f32 %v122_v60, 0.0 }
  0xa4   :  { %v139_v29 = vpop.f32.mrf.mxu2  ;;  %v157_v30 = vpop.f32.mrf.mxu3 }
  0xa5   :  { %v158_v31 = vadd.f32 %v311_v28, %v157_v30  ;;  %v140_v46 = vadd.f32 %v311_v28, %v139_v29 }
  0xa7   :  { %v175_v33 = vmax.f32 %v158_v31, 0.0  ;;  %v169_v50 = vmax.f32 %v140_v46, 0.0 }
  0xa8   :  { %v124_v48 = vpop.f32.mrf.mxu0 }
  0xa9   :  { %285 = vmatpush.xpose.msk.msra.mxu1 %vm177_vm1, %v175_v33  ;;  %v125_v59 = vadd.f32 %v311_v28, %v124_v48 }
  0xab   :  { %v164_v61 = vmax.f32 %v125_v59, 0.0 }
  0xac   :  { %v142_v37 = vpop.f32.mrf.mxu2 }
  0xad   :  { %286 = vmatpush.xpose.msk.msra.mxu1 %vm177_vm1, %v174_v36  ;;  %v143_v44 = vadd.f32 %v311_v28, %v142_v37 }
  0xaf   :  { %v170_v47 = vmax.f32 %v143_v44, 0.0 }
  0xb0   :  { %v127_v53 = vpop.f32.mrf.mxu0 }
  0xb1   :  { %287 = vmatpush.xpose.msk.msra.mxu1 %vm177_vm1, %v173_v39  ;;  %v128_v56 = vadd.f32 %v311_v28, %v127_v53 }
  0xb3   :  { %v165_v58 = vmax.f32 %v128_v56, 0.0 }
  0xb4   :  { %v145_v42 = vpop.f32.mrf.mxu2 }
  0xb5   :  { %v146_v43 = vadd.f32 %v311_v28, %v145_v42  ;;  %288 = vmatpush.xpose.msk.msra.mxu1 %vm177_vm1, %v172_v41 }
  0xb7   :  { %v171_v45 = vmax.f32 %v146_v43, 0.0 }
  0xb9   :  { %289 = vmatpush.xpose.msk.msra.mxu1 %vm177_vm1, %v171_v45 }
  0xbd   :  { %290 = vmatpush.xpose.msk.msra.mxu1 %vm177_vm1, %v170_v47 }
  0xc1   :  { %291 = vmatpush.xpose.msk.msra.mxu1 %vm177_vm1, %v169_v50 }
  0xc5   :  { %292 = vmatpush.xpose.msk.msra.mxu1 %vm177_vm1, %v168_v52 }
  0xc9   :  { %293 = vmatpush.xpose.msk.msra.mxu1 %vm177_vm1, %v167_v55 }
  0xcd   :  { %294 = vmatpush.xpose.msk.msra.mxu1 %vm177_vm1, %v166_v57 }
  0xd1   :  { %295 = vmatpush.xpose.msk.msra.mxu1 %vm177_vm1, %v165_v58 }
  0xd5   :  { %296 = vmatpush.xpose.msk.msra.mxu1 %vm177_vm1, %v164_v61 }
  0xd9   :  { %297 = vmatpush.xpose.msk.msra.mxu1 %vm177_vm1, %v163_v63 }
  0xdd   :  { %298 = vmatpush.xpose.msk.msra.mxu1 %vm177_vm1, %v162_v1 }
  0xe1   :  { %299 = vmatpush.xpose.msk.msra.mxu1 %vm177_vm1, %v161_v3 }
  0xe5   :  { %300 = vmatpush.xpose.msk.msra.mxu1 %vm177_vm1, %v160_v4 }
  0xe8   :  { %301 = vmatmul.msk.f32.vlgmr.msra.gmra.mxu1 %vm177_vm1, %v176_v5 }
 0x165   :  { %v246_v7 = vpop.f32.mrf.mxu1 }
 0x166   :  { %v251_v8 = vadd.f32 %v250_v6, %v246_v7 }
 0x168   :  { %252 = vst [vmem:[#allocation3] sm:$0x1] %v251_v8 }
 0x169   :  { %263 = dma.vmem_to_hbm [thread:$0]  %s259_s11, 16, %s261_s14, [#allocation4]  }
 0x16a   :  { %336 = dma.done.wait [#allocation4], 16  }
 0x16b   :  { %337 = vsyncadd [#allocation4], 4294967280 }
 0x16c   :  { %268 = vsyncpa [#allocation4], 1 }

</bundles_post_ra>
